<compile_context>
chip_gen: v5e
topology: v5e:2x2
jax: 0.10.0
libtpu: 0.0.40
codegen_flags: <defaults>
</compile_context>

<pallas_src>
import functools

import jax
import jax.numpy as jnp
from jax import lax
from jax.experimental import pallas as pl
from jax.experimental.pallas import tpu as pltpu


def _hash_u32(x):
    """lowbias32-style integer mixer; portable (VPU integer ops only)."""
    x = x ^ (x >> 16)
    x = x * jnp.uint32(0x7FEB352D)
    x = x ^ (x >> 15)
    x = x * jnp.uint32(0x846CA68B)
    x = x ^ (x >> 16)
    return x


def _embedding_kernel(seed_ref, ids_ref, hi_ref, mid_ref, lo_ref, out_ref, *,
                      dropout_p, training):
    """One grid step: gather a tile of embedding rows + optional fused dropout.

    seed_ref            : SMEM (1,) int32   -- scalar-prefetched dropout seed
    ids_ref             : VMEM (T, 1) int32 -- this tile's token ids
    hi/mid/lo_ref       : VMEM (V, E) bf16  -- f32 table split into bf16 parts
    out_ref             : VMEM (T, E) f32
    """
    ids = ids_ref[...]                                   # (T, 1)
    tile_tokens = ids.shape[0]
    vocab = hi_ref.shape[0]
    embed = hi_ref.shape[1]

    # Vectorized gather via one-hot MXU matmuls: (T,V)bf16 @ (V,E)bf16 -> f32.
    # Each one-hot row has exactly one 1, so every pass is an exact row pick;
    # hi + mid + lo reconstructs the f32 table to ~1 ulp.
    vocab_iota = lax.broadcasted_iota(jnp.int32, (tile_tokens, vocab), 1)
    onehot = (ids == vocab_iota).astype(jnp.bfloat16)
    x = jnp.dot(onehot, hi_ref[...], preferred_element_type=jnp.float32)
    x = x + jnp.dot(onehot, mid_ref[...], preferred_element_type=jnp.float32)
    x = x + jnp.dot(onehot, lo_ref[...], preferred_element_type=jnp.float32)

    if training and dropout_p > 0.0:
        # Inverted dropout fused into the single output store. Keep-mask from a
        # counter hash of (seed, global element index): integer-domain compare
        # (no u32->f32 convert), 1/(1-p) folded into one multiply.
        row = lax.broadcasted_iota(jnp.int32, (tile_tokens, embed), 0)
        col = lax.broadcasted_iota(jnp.int32, (tile_tokens, embed), 1)
        tile_base = pl.program_id(0) * tile_tokens
        flat = ((tile_base + row) * embed + col).astype(jnp.uint32)
        seed_u = seed_ref[0].astype(jnp.uint32) * jnp.uint32(0x9E3779B9)
        bits = _hash_u32(flat + seed_u)
        threshold = jnp.uint32(min(int(dropout_p * 4294967296.0), 4294967295))
        scale = jnp.float32(1.0 / (1.0 - dropout_p))
        x = jnp.where(bits >= threshold, x * scale, jnp.float32(0.0))

    out_ref[...] = x.astype(out_ref.dtype)


def _split_f32_to_bf16x3(table_f32):
    """Split an f32 table into 3 bf16 parts with hi+mid+lo ~= table (f32 ulp)."""
    hi = table_f32.astype(jnp.bfloat16)
    r1 = table_f32 - hi.astype(jnp.float32)
    mid = r1.astype(jnp.bfloat16)
    lo = (r1 - mid.astype(jnp.float32)).astype(jnp.bfloat16)
    return hi, mid, lo


def _choose_tokens_per_tile(num_tokens, vocab, requested):
    """Pick a token tile: big (store-roofline + per-step overhead), but
    (a) capped so the (T,V) one-hot/iota temporaries stay ~<= 8 MiB,
    (b) >= 2 tiles so the 'parallel' axis can split across v7x's two TCs,
    (c) preferably an exact divisor of num_tokens (no padding / no post-slice)."""
    t = max(8, min(int(requested), 1024))
    t = min(t, max(8, (8 * 1024 * 1024) // (6 * vocab)))    # (T,V) temporaries
    t = min(t, max(8, (num_tokens + 1) // 2))                # >= 2 tiles
    t = max(8, (t // 8) * 8)                                 # sublane multiple
    if num_tokens % t != 0:
        for cand in range(t, 7, -8):
            if num_tokens % cand == 0:
                return cand
    return t


def bert_embedding(sequence, table, *, dropout_p=0.1, training=False,
                   seed=0, tokens_per_tile=1024):
    """Pallas equivalent of BERTEmbedding.forward(sequence)."""
    B, S = sequence.shape
    V, E = table.shape
    num_tokens = B * S

    # VMEM-resident one-hot path only (small/medium vocab); see TODO above for
    # the HBM-resident DMA-gather path needed at real BERT vocab sizes.
    assert V * E * 4 <= 8 * 1024 * 1024, (
        "vocab too large for the VMEM-resident one-hot path")

    tpt = _choose_tokens_per_tile(num_tokens, V, tokens_per_tile)
    num_tiles = pl.cdiv(num_tokens, tpt)
    padded_tokens = num_tiles * tpt

    ids = sequence.reshape(num_tokens).astype(jnp.int32)
    if padded_tokens != num_tokens:
        # Pad with token 0 (padding_idx row); padded rows sliced off below.
        ids = jnp.concatenate(
            [ids, jnp.zeros((padded_tokens - num_tokens,), jnp.int32)])
    ids = ids.reshape(padded_tokens, 1)

    # Exact-gather table split (in a real model precompute this once at init).
    hi, mid, lo = _split_f32_to_bf16x3(table.astype(jnp.float32))

    seed_arr = jnp.array([seed], dtype=jnp.int32)

    kernel = functools.partial(
        _embedding_kernel,
        dropout_p=float(dropout_p),
        training=bool(training),
    )

    # Scoped-VMEM budget: 3 bf16 table parts (worst-case double-buffered),
    # double-buffered ids/output tiles, plus the in-kernel (T,V) one-hot bf16 +
    # int32 iota and (T,E) f32/hash-iota temporaries.
    table_bytes = 2 * 3 * V * E * 2
    out_bytes = 2 * tpt * E * 4
    ids_bytes = 2 * tpt * 128 * 4            # (T,1) i32 pads to 128 lanes
    tmp_bytes = tpt * V * (2 + 4) + tpt * E * (4 + 4 + 4)
    vmem_limit = int(max(table_bytes + out_bytes + ids_bytes + tmp_bytes
                         + (2 << 20), 16 << 20))

    out_flat = pl.pallas_call(
        kernel,
        out_shape=jax.ShapeDtypeStruct((padded_tokens, E), table.dtype),
        grid_spec=pltpu.PrefetchScalarGridSpec(
            num_scalar_prefetch=1,                      # dropout seed -> SMEM
            grid=(num_tiles,),
            in_specs=[
                # Per-tile token ids (tiny block, bounded footprint).
                pl.BlockSpec((tpt, 1), lambda i, seed: (i, 0)),
                # Full table parts, constant block index -> fetched once and
                # kept resident across all grid steps.
                pl.BlockSpec((V, E), lambda i, seed: (0, 0)),
                pl.BlockSpec((V, E), lambda i, seed: (0, 0)),
                pl.BlockSpec((V, E), lambda i, seed: (0, 0)),
            ],
            out_specs=pl.BlockSpec((tpt, E), lambda i, seed: (i, 0)),
        ),
        compiler_params=pltpu.CompilerParams(
            dimension_semantics=("parallel",),          # disjoint output tiles
            vmem_limit_bytes=vmem_limit,
        ),
    )(seed_arr, ids, hi, mid, lo)

    if padded_tokens != num_tokens:
        out_flat = out_flat[:num_tokens]
    return out_flat.reshape(B, S, E)


def init_bert_embedding_params(key, vocab_size, embed_size):
    """Init matching nn.Embedding(vocab, embed, padding_idx=0):
    weights ~ N(0, 1), row 0 (padding_idx) zeroed."""
    table = jax.random.normal(key, (vocab_size, embed_size), dtype=jnp.float32)
    table = table.at[0].set(0.0)
    return table


if __name__ == "__main__":
    vocab_size = 64
    embed_size = 128   # lane-dense last dim
    batch, seq = 2, 8  # 16 tokens -> two 8-token tiles (no padding, 2 tiles)

    key = jax.random.PRNGKey(0)
    k_tbl, k_ids = jax.random.split(key)

    table = init_bert_embedding_params(k_tbl, vocab_size, embed_size)
    sequence = jax.random.randint(k_ids, (batch, seq), 0, vocab_size,
                                  dtype=jnp.int32)

    # Eval-mode forward (dropout = identity), same as model.eval() in PyTorch.
    out = bert_embedding(sequence, table, dropout_p=0.1, training=False)
    out = jax.block_until_ready(out)

    # Sanity check against a pure-JAX reference of the same semantics.
    ref = jnp.take(table, sequence, axis=0)
    assert out.shape == (batch, seq, embed_size)
    assert jnp.allclose(out, ref, rtol=1e-6, atol=1e-6), "mismatch vs reference"
    # padding_idx=0 rows must be exactly zero.
    assert jnp.all(out[sequence == 0] == 0.0)

    # Training-mode check: dropped elements are exactly zero, kept elements are
    # scaled by 1/(1-p), and a plausible fraction is dropped.
    p = 0.1
    out_tr = jax.block_until_ready(
        bert_embedding(sequence, table, dropout_p=p, training=True, seed=123))
    assert out_tr.shape == (batch, seq, embed_size)
    kept = out_tr != 0.0
    nonpad = (sequence != 0)[..., None] & (ref != 0.0)
    assert jnp.allclose(jnp.where(kept & nonpad, out_tr, 0.0),
                        jnp.where(kept & nonpad, ref / (1.0 - p), 0.0),
                        rtol=1e-5, atol=1e-6)
    drop_frac = jnp.mean((out_tr[sequence != 0] == 0.0).astype(jnp.float32))
    assert 0.0 < float(drop_frac) < 0.35

    print("KERNEL_OK")
</pallas_src>

<mosaic_0001>
module attributes {stable_mosaic.version = 11 : i64} {
  func.func @_embedding_kernel(%arg0: i32, %arg1: memref<1xi32, #tpu.memory_space<smem>>, %arg2: memref<8x1xi32, #tpu.memory_space<vmem>>, %arg3: memref<64x128xbf16, #tpu.memory_space<vmem>>, %arg4: memref<64x128xbf16, #tpu.memory_space<vmem>>, %arg5: memref<64x128xbf16, #tpu.memory_space<vmem>>, %arg6: memref<8x128xf32, #tpu.memory_space<vmem>>) attributes {dimension_semantics = [#tpu.dimension_semantics<parallel>], iteration_bounds = array<i64: 2>, scalar_prefetch = 1 : i64, scratch_operands = 0 : i64, tpu.core_type = #tpu.core_type<tc>, window_params = [{transform_indices = @transform_0, window_bounds = array<i64: 8, 1>}, {pipeline_mode = #tpu.pipeline_mode<synchronous>, transform_indices = @transform_1, window_bounds = array<i64: 64, 128>}, {pipeline_mode = #tpu.pipeline_mode<synchronous>, transform_indices = @transform_2, window_bounds = array<i64: 64, 128>}, {pipeline_mode = #tpu.pipeline_mode<synchronous>, transform_indices = @transform_3, window_bounds = array<i64: 64, 128>}, {transform_indices = @transform_4, window_bounds = array<i64: 8, 128>}]} {
    %c0 = arith.constant 0 : index
    %c0_0 = arith.constant 0 : index
    %0 = vector.load %arg2[%c0, %c0_0] : memref<8x1xi32, #tpu.memory_space<vmem>>, vector<8x1xi32>
    %1 = tpu.iota {dimensions = array<i32: 1>} : vector<8x64xi32>
    %2 = vector.broadcast %0 : vector<8x1xi32> to vector<8x64xi32>
    %3 = arith.cmpi eq, %2, %1 : vector<8x64xi32>
    %4 = arith.extui %3 : vector<8x64xi1> to vector<8x64xi32>
    %5 = arith.sitofp %4 : vector<8x64xi32> to vector<8x64xf32>
    %6 = arith.truncf %5 : vector<8x64xf32> to vector<8x64xbf16>
    %c0_1 = arith.constant 0 : index
    %c0_2 = arith.constant 0 : index
    %7 = vector.load %arg3[%c0_1, %c0_2] : memref<64x128xbf16, #tpu.memory_space<vmem>>, vector<64x128xbf16>
    %cst = arith.constant dense<0.000000e+00> : vector<8x128xf32>
    %8 = tpu.matmul %6, %7, %cst {dimension_numbers = #tpu.dot_dimension_numbers<[1], [0], [0], [1], [0, 0, 1, 1], [], []>} : vector<8x64xbf16>, vector<64x128xbf16>, vector<8x128xf32> -> vector<8x128xf32>
    %c0_3 = arith.constant 0 : index
    %c0_4 = arith.constant 0 : index
    %9 = vector.load %arg4[%c0_3, %c0_4] : memref<64x128xbf16, #tpu.memory_space<vmem>>, vector<64x128xbf16>
    %cst_5 = arith.constant dense<0.000000e+00> : vector<8x128xf32>
    %10 = tpu.matmul %6, %9, %cst_5 {dimension_numbers = #tpu.dot_dimension_numbers<[1], [0], [0], [1], [0, 0, 1, 1], [], []>} : vector<8x64xbf16>, vector<64x128xbf16>, vector<8x128xf32> -> vector<8x128xf32>
    %11 = arith.addf %8, %10 : vector<8x128xf32>
    %c0_6 = arith.constant 0 : index
    %c0_7 = arith.constant 0 : index
    %12 = vector.load %arg5[%c0_6, %c0_7] : memref<64x128xbf16, #tpu.memory_space<vmem>>, vector<64x128xbf16>
    %cst_8 = arith.constant dense<0.000000e+00> : vector<8x128xf32>
    %13 = tpu.matmul %6, %12, %cst_8 {dimension_numbers = #tpu.dot_dimension_numbers<[1], [0], [0], [1], [0, 0, 1, 1], [], []>} : vector<8x64xbf16>, vector<64x128xbf16>, vector<8x128xf32> -> vector<8x128xf32>
    %14 = arith.addf %11, %13 : vector<8x128xf32>
    %c0_9 = arith.constant 0 : index
    %c0_10 = arith.constant 0 : index
    %15 = vector.load %arg6[%c0_9, %c0_10] : memref<8x128xf32, #tpu.memory_space<vmem>>, vector<8x128xf32>
    tpu.vector_store %arg6[%c0_9, %c0_10], %14 {strides = array<i32>} : memref<8x128xf32, #tpu.memory_space<vmem>>, vector<8x128xf32>,
    return
  }
  func.func @transform_0(%arg0: i32, %arg1: memref<1xi32, #tpu.memory_space<smem>>) -> (i32, i32) {
    %c0_i32 = arith.constant 0 : i32
    %c0_i32_0 = arith.constant 0 : i32
    return %arg0, %c0_i32 : i32, i32
  }
  func.func @transform_1(%arg0: i32, %arg1: memref<1xi32, #tpu.memory_space<smem>>) -> (i32, i32) {
    %c0_i32 = arith.constant 0 : i32
    %c0_i32_0 = arith.constant 0 : i32
    %c0_i32_1 = arith.constant 0 : i32
    return %c0_i32, %c0_i32_0 : i32, i32
  }
  func.func @transform_2(%arg0: i32, %arg1: memref<1xi32, #tpu.memory_space<smem>>) -> (i32, i32) {
    %c0_i32 = arith.constant 0 : i32
    %c0_i32_0 = arith.constant 0 : i32
    %c0_i32_1 = arith.constant 0 : i32
    return %c0_i32, %c0_i32_0 : i32, i32
  }
  func.func @transform_3(%arg0: i32, %arg1: memref<1xi32, #tpu.memory_space<smem>>) -> (i32, i32) {
    %c0_i32 = arith.constant 0 : i32
    %c0_i32_0 = arith.constant 0 : i32
    %c0_i32_1 = arith.constant 0 : i32
    return %c0_i32, %c0_i32_0 : i32, i32
  }
  func.func @transform_4(%arg0: i32, %arg1: memref<1xi32, #tpu.memory_space<smem>>) -> (i32, i32) {
    %c0_i32 = arith.constant 0 : i32
    %c0_i32_0 = arith.constant 0 : i32
    return %arg0, %c0_i32 : i32, i32
  }
}

</mosaic_0001>

<bundles_post_ra>
// kernel: tpu_custom_call.1
= control target key start
LH: loop header
LB: loop body
LE: loop exit
PB: predicated region body
PF: predicated region fallthrough
CT: control target
= control target key end

     0   :  { %11 = vsyncpa [#allocation5], 0  ;;  %s980_s0 = inlined_call_operand.<no memory space> [shape: s32[1], index: 0, kind: input, shape index: {}]   ;;  %s981_s1 = inlined_call_operand.vmem [shape: s32[16,1], index: 1, kind: input, shape index: {}]   ;;  %s982_s2 = inlined_call_operand.hbm [shape: bf16[64,128], index: 2, kind: input, shape index: {}]   ;;  %s983_s3 = inlined_call_operand.hbm [shape: bf16[64,128], index: 3, kind: input, shape index: {}]   ;;  %s984_s4 = inlined_call_operand.hbm [shape: bf16[64,128], index: 4, kind: input, shape index: {}]   ;;  %s985_s5 = inlined_call_operand.hbm [shape: f32[16,128], index: 5, kind: output, shape index: {}]  }
   0x1   :  { %12 = vsyncpa [#allocation8], 0 }
   0x2   :  { %13 = vsyncpa [#allocation6], 0 }
   0x3   :  { %15 = vsyncpa [#allocation6 + $0x1], 0  ;;  %s857_s0 = smov 0   ;;  %s859_s18 = smov 0  }
   0x4   :  { %s861_s19 = smov 0   ;;  %s863_s20 = smov 0  }
   0x5 LB: > { %s878_s21 = sadd.s32 4294967295, %s818_s20   ;;  %s503_s22 = sadd.s32 4294967294, %s818_s20   ;;  %s818_s20 = sphi %s863_s20, %s993_s20   ;;  %s814_s19 = sphi %s861_s19, %s992_s19   ;;  %s810_s18 = sphi %s859_s18, %s991_s18   ;;  %s806_s0 = sphi %s857_s0, %s990_s0  }
   0x6   : > { %s882_s23 = sadd.s32 1, %s818_s20   ;;  %s117_s24 = sadd.s32 1, %s814_s19 }
   0x7   : > { %s114_s25 = ssub.s32 %s818_s20, %s882_s23  ;;  %p127_p0 = scmp.ne.s32.totalorder %s814_s19, %s810_s18 }
   0x8   : > { %p115_p1 = scmp.eq.s32.totalorder %s114_s25, 0  ;;  %p128_p2 = scmp.eq.s32.totalorder %s878_s21, 1 }
   0x9   : > { %p133_p3 = scmp.ne.s32.totalorder %s810_s18, %s806_s0  ;;  %p134_p4 = scmp.eq.s32.totalorder %s503_s22, 1 }
   0xa   : > { %s893_s26 = scalar_select %p115_p1, %s814_s19, %s117_s24  }
   0xb   : > { %p895_p5 = por %p128_p2, %p127_p0  ;;  %p899_p6 = por %p134_p4, %p133_p3 }
   0xc   : > { %p504_p7 = scmp.ge.s32.totalorder %s818_s20, 1  ;;  %p141_p8 = scmp.lt.s32.totalorder %s818_s20, 3 }
   0xd   : > { %p611_p9 = scmp.eq.s32.totalorder %s878_s21, 0  ;;  %s166_s7 = sshll.u32 %s983_s3, 4  ;;  %s167_s7 = int_to_ptr.hbm [resolvable:$true] %s166_s7 }
   0xe   : > { %p906_p10 = pnand %p504_p7, %p141_p8  ;;  %s152_s10 = sshll.u32 %s982_s2, 4  ;;  %s153_s10 = int_to_ptr.hbm [resolvable:$true] %s152_s10 }
   0xf   : > { %s820_s12 = smov [#allocation7]   ;;  %s821_s14 = smov 64  }
  0x10   : > { %p597_p11 = pneg %p906_p10  ;;  %s168_s13 = sshll.u32 %s820_s12, 4  ;;  %s169_s13 = int_to_ptr.vmem [resolvable:$true] %s168_s13 }
  0x11   : > { %s822_s15 = smov 4   ;;  %s823_s16 = smov [#allocation4]  }
  0x12   : > { %p920_p12 = pnand %p611_p9, %p597_p11  ;;  %s154_s17 = sshll.u32 %s823_s16, 4  ;;  %s155_s17 = int_to_ptr.vmem [resolvable:$true] %s154_s17 }
  0x13   : > { %s180_s25 = sshll.u32 %s984_s4, 4  ;;  %s824_s30 = smov [#allocation9]   ;;  %s181_s25 = int_to_ptr.hbm [resolvable:$true] %s180_s25 }
  0x14   : > { %603 = dma.hbm_to_vmem [thread:$0]  (!%p920_p12), %s167_s7, 512, %s169_s13, [#allocation8], %s821_s14, %s821_s14, %s822_s15  }
  0x15   : > { %600 = dma.hbm_to_vmem [thread:$0]  (!%p920_p12), %s153_s10, 512, %s155_s17, [#allocation5], %s821_s14, %s821_s14, %s822_s15  }
  0x16   : > { %s182_s6 = sshll.u32 %s824_s30, 4  ;;  %205 = sbr.rel (%p906_p10) target bundleno = 297 (0x129), region = 36  ;;  %s183_s6 = int_to_ptr.vmem [resolvable:$true] %s182_s6 }
  0x17   : > { %606 = dma.hbm_to_vmem [thread:$0]  (!%p920_p12), %s181_s25, 512, %s183_s6, [#allocation8], %s821_s14, %s821_s14, %s822_s15  }
  0x1b   : > { %793 = dma.done.wait (%p611_p9), [#allocation5], 512  }
  0x1c   : > { %795 = vsyncadd (%p611_p9), [#allocation5], 4294966784 }
  0x1d   : > { %797 = dma.done.wait (%p611_p9), [#allocation8], 1024  }
  0x1e   : > { %799 = vsyncadd (%p611_p9), [#allocation8], 4294966272  ;;  %p241_p13 = scmp.lt.s32.totalorder %s878_s21, 1  ;;  %v825_v0 = vmov 0   ;;  %v578_v2 = vld [vmem:[#allocation7 + $0x18] sm:$0xff]  ;;  %v577_v5 = vld [vmem:[#allocation7 + $0x10] sm:$0xff]  ;;  %v247_v14 = vlaneseq }
  0x1f   : > { %657 = vset.pattern.permute.xlu0 %v825_v0  ;;  %v574_v3 = vld [vmem:[#allocation4 + $0x18] sm:$0xff]  ;;  %304 = vmatpush.bf16.msra.mxu0 %v578_v2  ;;  %v573_v6 = vld [vmem:[#allocation4 + $0x10] sm:$0xff]  ;;  %v576_v8 = vld [vmem:[#allocation7 + $0x8] sm:$0xff]  ;;  %v826_v17 = vmov 0.0   ;;  %vm296_vm1 = vcmask 523264   ;;  %s238_s11 = sand.u32 1, %s810_s18  }
  0x20   : > { %s242_s7 = scalar_select %p241_p13, %s878_s21, 1  ;;  %v582_v4 = vld [vmem:[#allocation9 + $0x18] sm:$0xff]  ;;  %341 = vmatpush.bf16.msra.mxu1 %v574_v3  ;;  %v581_v7 = vld [vmem:[#allocation9 + $0x10] sm:$0xff]  ;;  %v572_v9 = vld [vmem:[#allocation4 + $0x8] sm:$0xff]  ;;  %v248_v15 = vand.u32 127, %v247_v14 }
  0x21   : > { %386 = vmatpush.bf16.msra.mxu2 %v582_v4  ;;  %v580_v10 = vld [vmem:[#allocation9 + $0x8] sm:$0xff]  ;;  %v575_v11 = vld [vmem:[#allocation7] sm:$0xff]  ;;  %s568_s12 = sshll.u32 %s878_s21, 3  ;;  %s513_s13 = sshll.u32 %s238_s11, 3 }
  0x22   : > { %s514_s29 = sshll.u32 %s242_s7, 3  ;;  %v571_v12 = vld [vmem:[#allocation4] sm:$0xff]  ;;  %s408_s16 = scalar_lea.hbm %s985_s5, %s568_s12 }
  0x23   : > { %s244_s10 = scalar_lea.vmem %s981_s1, %s514_s29  ;;  %305 = vmatpush.bf16.msra.mxu0 %v577_v5  ;;  %v579_v13 = vld [vmem:[#allocation9] sm:$0xff]  ;;  %s240_s17 = scalar_lea.vmem [#allocation10], %s513_s13 }
  0x24   : > { %v246_v1 = vld [vmem:[%s244_s10] sm:$0xff]  ;;  %342 = vmatpush.bf16.msra.mxu1 %v573_v6  ;;  %s410_s22 = sshll.u32 %s240_s17, 4  ;;  %s412_s24 = sshll.u32 %s408_s16, 4  ;;  %s411_s22 = int_to_ptr.vmem [resolvable:$true] %s410_s22  ;;  %s413_s24 = int_to_ptr.hbm [resolvable:$true] %s412_s24 }
  0x25   : > { %250 = vperm.xlu0 %657, %v246_v1   ;;  %387 = vmatpush.bf16.msra.mxu2 %v581_v7  ;;  %s398_s21 = scalar_lea.sflag [#allocation6], %s238_s11  ;;  %s762_s25 = sshra.s32 %s413_s24, 4  ;;  %s763_s25 = int_to_ptr.hbm [resolvable:$true] %s762_s25 }
  0x26   : > { %s764_s30 = scalar_lea.hbm %s763_s25, 8  ;;  %s768_s29 = scalar_lea.hbm %s985_s5, 16 }
  0x27   : > { %306 = vmatpush.bf16.msra.mxu0 %v576_v8  ;;  %p765_p0 = scmp.ne.s32.totalorder %s763_s25, %s764_s30  ;;  %p769_p3 = scmp.lt.s32.totalorder %s763_s25, %s985_s5 }
  0x28   : > { %343 = vmatpush.bf16.msra.mxu1 %v572_v9  ;;  %p770_p4 = scmp.lt.s32.totalorder %s768_s29, %s764_s30 }
  0x29   : > { %388 = vmatpush.bf16.msra.mxu2 %v580_v10  ;;  %p766_p1 = pnand %p765_p0, %p895_p5 }
  0x2a   : > { %p771_p7 = por %p770_p4, %p769_p3 }
  0x2b   : > { %307 = vmatpush.bf16.msra.mxu0 %v575_v11  ;;  %p767_p2 = pneg %p766_p1 }
  0x2c   : > { %344 = vmatpush.bf16.msra.mxu1 %v571_v12 }
  0x2d   : > { %389 = vmatpush.bf16.msra.mxu2 %v579_v13  ;;  %p772_p8 = pnand %p771_p7, %p767_p2 }
  0x97   : > { %v251_v16 = vpop.permute.xlu0 %250 }
  0x98   : > { %vm252_vm0 = vcmp.eq.s32.totalorder %v251_v16, %v248_v15 }
  0x99   : > { %v515_v18 = vsel %vm252_vm0, 1.0, %v826_v17 }
  0x9a   : > { %v255_v19 = vpack.c.bf16 %v515_v18, %v515_v18 }
  0x9c   : > { %532 = vmatmul.msk.bf16.vlgmr.msra.gmra.mxu0 %vm296_vm1, %v255_v19  ;;  %549 = vmatmul.msk.bf16.vlgmr.msra.gmra.mxu1 %vm296_vm1, %v255_v19 }
  0x9d   : > { %566 = vmatmul.msk.bf16.vlgmr.msra.gmra.mxu2 %vm296_vm1, %v255_v19 }
 0x119   : > { %v309_v20 = vpop.f32.mrf.mxu0  ;;  %v346_v21 = vpop.f32.mrf.mxu1 }
 0x11a   : > { %v347_v22 = vadd.f32 %v346_v21, %v309_v20 }
 0x120   : > { %v391_v23 = vpop.f32.mrf.mxu2 }
 0x121   : > { %v395_v24 = vadd.f32 %v391_v23, %v347_v22  ;;  %v311_v25 = vpop.f32.mrf.mxu0  ;;  %v348_v26 = vpop.f32.mrf.mxu1 }
 0x123   : > { %396 = vst [vmem:[%s240_s17] sm:$0xff] %v395_v24 }
 0x124   : > { %775 = shalt.err (!%p772_p8)
}
 0x125   : > { %595 = dma.vmem_to_hbm [thread:$0]  (%p895_p5), %s411_s22, 128, %s413_s24, %s398_s21  }
 0x128   : > { %v393_v27 = vpop.f32.mrf.mxu2 }
 0x129 PF: > { %p617_p9 = scmp.ge.s32.totalorder %s818_s20, 2  ;;  %s424_s10 = sand.u32 1, %s806_s0  }
 0x12a   : > { %s425_s11 = scalar_lea.sflag [#allocation6], %s424_s10 }
 0x12b   : > { %p608_p10 = pnand %p617_p9, %p899_p6 }
 0x12d   : > { %p609_p11 = pneg %p608_p10 }
 0x12f   : > { %801 = dma.done.wait (%p609_p11), %s425_s11, 128  }
 0x130   : > { %803 = vsyncadd (%p609_p11), %s425_s11, 4294967168  ;;  %p18_p12 = scmp.ge.s32.totalorder %s882_s23, 4   ;;  %s990_s0 = smov %s810_s18 }
 0x131   : > { %s991_s18 = smov %s814_s19  ;;  %s992_s19 = smov %s893_s26 }
 0x132   : > { %s993_s20 = smov %s882_s23  ;;  %20 = sbr.rel (!%p18_p12) target bundleno = 5 (0x5), region = 84 }
 0x137   :  { %431 = vsyncpa [#allocation5], 1 }
 0x138   :  { %433 = vsyncpa [#allocation5 + $0x1], 1 }
 0x139   :  { %434 = vsyncpa [#allocation8], 1 }
 0x13a   :  { %435 = vsyncpa [#allocation6], 1 }
 0x13b   :  { %437 = vsyncpa [#allocation6 + $0x1], 1 }

</bundles_post_ra>
